<compile_context>
chip_gen: v5e
topology: v5e:2x2
jax: 0.10.0
libtpu: 0.0.40
codegen_flags: <defaults>
</compile_context>

<pallas_src>
import functools
import math

import jax
import jax.numpy as jnp
from jax.experimental import pallas as pl
from jax.experimental.pallas import tpu as pltpu


def _round_up(x, m):
    return ((x + m - 1) // m) * m


def _pick_tile(dim, align, max_tile):
    """Choose (tile, padded_dim) for one dimension, preferring zero padding.

    A dim that fits in a single tile is used as-is (full-extent blocks of any
    size are legal).  Otherwise the dim is padded to a multiple of `align` and
    the largest align-multiple tile <= max_tile dividing the padded dim is
    used.
    """
    if dim <= max_tile:
        return dim, dim
    padded = _round_up(dim, align)
    tile = (max_tile // align) * align
    while padded % tile != 0:
        tile -= align
    return tile, padded


def _cond_linear_kernel(arch_ref, x_ref, w_ref, b_ref, o_ref, acc_ref):
    # arch_ref : SMEM (1,) int32  (consumed only by the BlockSpec index_maps)
    # x_ref    : (tm, tk)
    # w_ref    : (tn, tk)   active-arch slice, arch dim squeezed
    # b_ref    : (1, tn)    active-arch slice, arch dim squeezed
    # o_ref    : (tm, tn)
    # acc_ref  : (tm, tn) f32 accumulator scratch
    del arch_ref
    k = pl.program_id(2)

    @pl.when(k == 0)
    def _():
        acc_ref[...] = jnp.zeros_like(acc_ref)

    # Contract x's last dim against w's last dim (Linear layout, no transpose).
    acc_ref[...] += jax.lax.dot_general(
        x_ref[...], w_ref[...],
        dimension_numbers=(((1,), (1,)), ((), ())),
        preferred_element_type=jnp.float32)

    @pl.when(k == pl.num_programs(2) - 1)
    def _():
        o_ref[...] = (acc_ref[...] +
                      b_ref[...].astype(jnp.float32)).astype(o_ref.dtype)


def _cond_linear_kernel_nobias(arch_ref, x_ref, w_ref, o_ref, acc_ref):
    del arch_ref
    k = pl.program_id(2)

    @pl.when(k == 0)
    def _():
        acc_ref[...] = jnp.zeros_like(acc_ref)

    acc_ref[...] += jax.lax.dot_general(
        x_ref[...], w_ref[...],
        dimension_numbers=(((1,), (1,)), ((), ())),
        preferred_element_type=jnp.float32)

    @pl.when(k == pl.num_programs(2) - 1)
    def _():
        o_ref[...] = acc_ref[...].astype(o_ref.dtype)


@functools.partial(jax.jit, static_argnames=("compute_dtype",))
def cond_linear(x, weight, bias, active_arch, *, compute_dtype=None):
    """y = x @ weight[active_arch].T + bias[active_arch]

    x:           (..., in_features)
    weight:      (num_archs, out_features, in_features)
    bias:        (num_archs, out_features) or None
    active_arch: scalar int (clamped to [0, num_archs-1])
    compute_dtype: optional dtype (e.g. jnp.bfloat16) to stream x / the active
                   weight slice in; accumulation and bias add stay f32.
    """
    out_dtype = x.dtype
    num_archs, out_features, in_features = weight.shape
    assert x.shape[-1] == in_features
    lead_shape = x.shape[:-1]

    x2 = x.reshape(-1, in_features)
    M = x2.shape[0]

    if compute_dtype is not None and x2.dtype != compute_dtype:
        x2 = x2.astype(compute_dtype)

    # Tile choices (avoid padding whenever possible; last dims 128-aligned
    # when tiled so loads/stores stay lane-dense).
    tm, Mp = _pick_tile(M, 8, 256)
    tn, Np = _pick_tile(out_features, 128, 512)
    tk, Kp = _pick_tile(in_features, 128, 512)

    # Clamp the arch index so an out-of-range value cannot select OOB blocks.
    arch_c = jnp.clip(jnp.asarray(active_arch, jnp.int32), 0, num_archs - 1)

    needs_w_pad = (Np != out_features) or (Kp != in_features)
    convert_w = compute_dtype is not None and weight.dtype != compute_dtype
    pre_slice = needs_w_pad or convert_w

    if pre_slice:
        # Touch only the active arch's slab when padding / casting is needed
        # (never materialise a padded / cast copy of every arch).
        w_in = jax.lax.dynamic_index_in_dim(weight, arch_c, axis=0,
                                            keepdims=True)
        if convert_w:
            w_in = w_in.astype(compute_dtype)
        if needs_w_pad:
            w_in = jnp.pad(w_in, ((0, 0),
                                  (0, Np - out_features),
                                  (0, Kp - in_features)))
        b_in = None
        if bias is not None:
            b_in = jax.lax.dynamic_index_in_dim(bias, arch_c, axis=0,
                                                keepdims=True)
            if Np != out_features:
                b_in = jnp.pad(b_in, ((0, 0), (0, Np - out_features)))
        arch_idx = jnp.zeros((1,), jnp.int32)
    else:
        w_in = weight
        b_in = bias
        arch_idx = arch_c.reshape(1)

    if (Mp != M) or (Kp != in_features):
        x2 = jnp.pad(x2, ((0, Mp - M), (0, Kp - in_features)))

    grid = (Mp // tm, Np // tn, Kp // tk)

    x_spec = pl.BlockSpec((tm, tk), lambda m, n, k, arch: (m, k))
    w_spec = pl.BlockSpec((None, tn, tk), lambda m, n, k, arch: (arch[0], n, k))
    o_spec = pl.BlockSpec((tm, tn), lambda m, n, k, arch: (m, n))

    itemsize = jnp.dtype(x2.dtype).itemsize
    cost = pl.CostEstimate(
        flops=2 * Mp * Np * Kp,
        transcendentals=0,
        bytes_accessed=(Mp * Kp + Np * Kp + Np + Mp * Np) * itemsize)

    # Rough VMEM budget: double-buffered input/output tiles + f32 accumulator.
    tile_bytes = (2 * (tm * tk + tn * tk + tn) * itemsize
                  + 2 * tm * tn * itemsize + tm * tn * 4)
    vmem_limit = int(min(max(16 * 1024 * 1024, 4 * tile_bytes),
                         32 * 1024 * 1024))  # fits v5e / v6e / v7x scoped VMEM

    compiler_params = pltpu.CompilerParams(
        dimension_semantics=("parallel", "parallel", "arbitrary"),
        vmem_limit_bytes=vmem_limit)

    scratch = [pltpu.VMEM((tm, tn), jnp.float32)]

    if b_in is not None:
        b3 = b_in.reshape(b_in.shape[0], 1, Np)   # keep bias in f32
        b_spec = pl.BlockSpec((None, 1, tn),
                              lambda m, n, k, arch: (arch[0], 0, n))
        grid_spec = pltpu.PrefetchScalarGridSpec(
            num_scalar_prefetch=1, grid=grid,
            in_specs=[x_spec, w_spec, b_spec],
            out_specs=o_spec, scratch_shapes=scratch)
        out_p = pl.pallas_call(
            _cond_linear_kernel,
            out_shape=jax.ShapeDtypeStruct((Mp, Np), out_dtype),
            grid_spec=grid_spec,
            compiler_params=compiler_params,
            cost_estimate=cost,
        )(arch_idx, x2, w_in, b3)
    else:
        grid_spec = pltpu.PrefetchScalarGridSpec(
            num_scalar_prefetch=1, grid=grid,
            in_specs=[x_spec, w_spec],
            out_specs=o_spec, scratch_shapes=scratch)
        out_p = pl.pallas_call(
            _cond_linear_kernel_nobias,
            out_shape=jax.ShapeDtypeStruct((Mp, Np), out_dtype),
            grid_spec=grid_spec,
            compiler_params=compiler_params,
            cost_estimate=cost,
        )(arch_idx, x2, w_in)

    out = out_p[:M, :out_features]
    return out.reshape(lead_shape + (out_features,))


if __name__ == "__main__":
    key = jax.random.PRNGKey(0)
    k_w, k_b, k_x, k_w2, k_b2, k_x2 = jax.random.split(key, 6)

    # ---- Small shapes consistent with the module's forward ----------------
    B, in_features, out_features, num_archs, active_arch = 8, 32, 16, 3, 1

    # Deterministic init mirroring reset_parameters: U(-stdv, stdv).
    stdv = 1.0 / math.sqrt(in_features)
    weight = jax.random.uniform(k_w, (num_archs, out_features, in_features),
                                dtype=jnp.float32, minval=-stdv, maxval=stdv)
    bias = jax.random.uniform(k_b, (num_archs, out_features),
                              dtype=jnp.float32, minval=-stdv, maxval=stdv)
    x = jax.random.uniform(k_x, (B, in_features), dtype=jnp.float32)

    ref = x @ weight[active_arch].T + bias[active_arch]
    ref_nobias = x @ weight[active_arch].T

    out = jax.block_until_ready(cond_linear(x, weight, bias, active_arch))
    assert out.shape == (B, out_features)
    assert jnp.allclose(out, ref, atol=1e-4, rtol=1e-4)

    # bias=False path (static branch, no zero-bias DMA).
    out_nb = jax.block_until_ready(cond_linear(x, weight, None, active_arch))
    assert jnp.allclose(out_nb, ref_nobias, atol=1e-4, rtol=1e-4)

    # N-D input path (F.linear semantics over leading dims).
    x3 = x.reshape(2, 4, in_features)
    out3 = jax.block_until_ready(cond_linear(x3, weight, bias, active_arch))
    assert out3.shape == (2, 4, out_features)
    assert jnp.allclose(out3.reshape(B, out_features), ref,
                        atol=1e-4, rtol=1e-4)

    # bf16-weight path (bandwidth optimisation; f32 accumulate + f32 bias add).
    out_bf16 = jax.block_until_ready(
        cond_linear(x, weight, bias, active_arch, compute_dtype=jnp.bfloat16))
    assert jnp.allclose(out_bf16.astype(jnp.float32), ref, atol=1e-1)

    # ---- Larger aligned shapes: exercises the multi-tile (M, N, K) grid ----
    B2, in2, out2, na2, arch2 = 272, 1536, 1024, 2, 0
    stdv2 = 1.0 / math.sqrt(in2)
    weight2 = jax.random.uniform(k_w2, (na2, out2, in2), dtype=jnp.float32,
                                 minval=-stdv2, maxval=stdv2)
    bias2 = jax.random.uniform(k_b2, (na2, out2), dtype=jnp.float32,
                               minval=-stdv2, maxval=stdv2)
    x_big = jax.random.uniform(k_x2, (B2, in2), dtype=jnp.float32)

    ref2 = x_big @ weight2[arch2].T + bias2[arch2]
    out2_k = jax.block_until_ready(cond_linear(x_big, weight2, bias2, arch2))
    assert out2_k.shape == (B2, out2)
    assert jnp.allclose(out2_k, ref2, atol=3e-2, rtol=1e-2)

    print("KERNEL_OK")
</pallas_src>

<mosaic_0001>
module attributes {stable_mosaic.version = 11 : i64} {
  func.func @_cond_linear_kernel(%arg0: i32, %arg1: i32, %arg2: i32, %arg3: memref<1xi32, #tpu.memory_space<smem>>, %arg4: memref<8x32xf32, #tpu.memory_space<vmem>>, %arg5: memref<1x16x32xf32, #tpu.memory_space<vmem>>, %arg6: memref<1x1x16xf32, #tpu.memory_space<vmem>>, %arg7: memref<8x16xf32, #tpu.memory_space<vmem>>, %arg8: memref<8x16xf32, #tpu.memory_space<vmem>>) attributes {dimension_semantics = [#tpu.dimension_semantics<parallel>, #tpu.dimension_semantics<parallel>, #tpu.dimension_semantics<arbitrary>], iteration_bounds = array<i64: 1, 1, 1>, scalar_prefetch = 1 : i64, scratch_operands = 1 : i64, tpu.core_type = #tpu.core_type<tc>, window_params = [{transform_indices = @transform_0, window_bounds = array<i64: 8, 32>}, {transform_indices = @transform_1, window_bounds = array<i64: 1, 16, 32>}, {transform_indices = @transform_2, window_bounds = array<i64: 1, 1, 16>}, {transform_indices = @transform_3, window_bounds = array<i64: 8, 16>}]} {
    %c0_i32 = arith.constant 0 : i32
    %0 = arith.cmpi eq, %arg2, %c0_i32 : i32
    %1 = arith.extui %0 : i1 to i32
    %c0_i32_0 = arith.constant 0 : i32
    %2 = arith.cmpi ne, %1, %c0_i32_0 : i32
    scf.if %2 {
      %cst_11 = arith.constant 0.000000e+00 : f32
      %13 = vector.broadcast %cst_11 : f32 to vector<8x16xf32>
      %c0_12 = arith.constant 0 : index
      %c0_13 = arith.constant 0 : index
      %14 = vector.load %arg8[%c0_12, %c0_13] : memref<8x16xf32, #tpu.memory_space<vmem>>, vector<8x16xf32>
      tpu.vector_store %arg8[%c0_12, %c0_13], %13 {strides = array<i32>} : memref<8x16xf32, #tpu.memory_space<vmem>>, vector<8x16xf32>,
    } else {
    }
    %c0 = arith.constant 0 : index
    %c0_1 = arith.constant 0 : index
    %3 = vector.load %arg8[%c0, %c0_1] : memref<8x16xf32, #tpu.memory_space<vmem>>, vector<8x16xf32>
    %c0_2 = arith.constant 0 : index
    %c0_3 = arith.constant 0 : index
    %4 = vector.load %arg4[%c0_2, %c0_3] : memref<8x32xf32, #tpu.memory_space<vmem>>, vector<8x32xf32>
    %c0_4 = arith.constant 0 : index
    %c0_5 = arith.constant 0 : index
    %c0_6 = arith.constant 0 : index
    %5 = vector.load %arg5[%c0_4, %c0_5, %c0_6] : memref<1x16x32xf32, #tpu.memory_space<vmem>>, vector<1x16x32xf32>
    %6 = vector.shape_cast %5 : vector<1x16x32xf32> to vector<16x32xf32>
    %cst = arith.constant dense<0.000000e+00> : vector<8x16xf32>
    %7 = tpu.matmul %4, %6, %cst {dimension_numbers = #tpu.dot_dimension_numbers<[1], [1], [0], [0], [0, 0, 1, 0], [], []>} : vector<8x32xf32>, vector<16x32xf32>, vector<8x16xf32> -> vector<8x16xf32>
    %8 = arith.addf %3, %7 : vector<8x16xf32>
    %c0_7 = arith.constant 0 : index
    %c0_8 = arith.constant 0 : index
    %9 = vector.load %arg8[%c0_7, %c0_8] : memref<8x16xf32, #tpu.memory_space<vmem>>, vector<8x16xf32>
    tpu.vector_store %arg8[%c0_7, %c0_8], %8 {strides = array<i32>} : memref<8x16xf32, #tpu.memory_space<vmem>>, vector<8x16xf32>,
    %c0_i32_9 = arith.constant 0 : i32
    %10 = arith.cmpi eq, %arg2, %c0_i32_9 : i32
    %11 = arith.extui %10 : i1 to i32
    %c0_i32_10 = arith.constant 0 : i32
    %12 = arith.cmpi ne, %11, %c0_i32_10 : i32
    scf.if %12 {
      %c0_11 = arith.constant 0 : index
      %c0_12 = arith.constant 0 : index
      %13 = vector.load %arg8[%c0_11, %c0_12] : memref<8x16xf32, #tpu.memory_space<vmem>>, vector<8x16xf32>
      %c0_13 = arith.constant 0 : index
      %c0_14 = arith.constant 0 : index
      %c0_15 = arith.constant 0 : index
      %14 = vector.load %arg6[%c0_13, %c0_14, %c0_15] : memref<1x1x16xf32, #tpu.memory_space<vmem>>, vector<1x1x16xf32>
      %15 = vector.shape_cast %14 : vector<1x1x16xf32> to vector<1x16xf32>
      %16 = vector.broadcast %15 : vector<1x16xf32> to vector<8x16xf32>
      %17 = arith.addf %13, %16 : vector<8x16xf32>
      %c0_16 = arith.constant 0 : index
      %c0_17 = arith.constant 0 : index
      %18 = vector.load %arg7[%c0_16, %c0_17] : memref<8x16xf32, #tpu.memory_space<vmem>>, vector<8x16xf32>
      tpu.vector_store %arg7[%c0_16, %c0_17], %17 {strides = array<i32>} : memref<8x16xf32, #tpu.memory_space<vmem>>, vector<8x16xf32>,
    } else {
    }
    return
  }
  func.func @transform_0(%arg0: i32, %arg1: i32, %arg2: i32, %arg3: memref<1xi32, #tpu.memory_space<smem>>) -> (i32, i32) {
    %c0_i32 = arith.constant 0 : i32
    return %arg0, %arg2 : i32, i32
  }
  func.func @transform_1(%arg0: i32, %arg1: i32, %arg2: i32, %arg3: memref<1xi32, #tpu.memory_space<smem>>) -> (i32, i32, i32) {
    %c0 = arith.constant 0 : index
    %0 = memref.load %arg3[%c0] : memref<1xi32, #tpu.memory_space<smem>>
    %c0_i32 = arith.constant 0 : i32
    return %0, %arg1, %arg2 : i32, i32, i32
  }
  func.func @transform_2(%arg0: i32, %arg1: i32, %arg2: i32, %arg3: memref<1xi32, #tpu.memory_space<smem>>) -> (i32, i32, i32) {
    %c0 = arith.constant 0 : index
    %0 = memref.load %arg3[%c0] : memref<1xi32, #tpu.memory_space<smem>>
    %c0_i32 = arith.constant 0 : i32
    %c0_i32_0 = arith.constant 0 : i32
    return %0, %c0_i32, %arg1 : i32, i32, i32
  }
  func.func @transform_3(%arg0: i32, %arg1: i32, %arg2: i32, %arg3: memref<1xi32, #tpu.memory_space<smem>>) -> (i32, i32) {
    %c0_i32 = arith.constant 0 : i32
    return %arg0, %arg1 : i32, i32
  }
}

</mosaic_0001>

<bundles_post_ra>
// kernel: cond_linear.1
= control target key start
LH: loop header
LB: loop body
LE: loop exit
PB: predicated region body
PF: predicated region fallthrough
CT: control target
= control target key end

     0   :  { %10 = vsyncpa [#allocation6], 0  ;;  %s251_s0 = inlined_call_operand.<no memory space> [shape: s32[1], index: 0, kind: input, shape index: {}]   ;;  %s252_s1 = inlined_call_operand.vmem [shape: f32[8,32], index: 1, kind: input, shape index: {}]   ;;  %s253_s2 = inlined_call_operand.hbm [shape: f32[3,16,32], index: 2, kind: input, shape index: {}]   ;;  %s254_s3 = inlined_call_operand.vmem [shape: f32[3,1,16], index: 3, kind: input, shape index: {}]   ;;  %s255_s4 = inlined_call_operand.hbm [shape: f32[8,16], index: 4, kind: output, shape index: {}]  }
   0x1   :  { %11 = vsyncpa [#allocation7], 0  ;;  %s132_s17 = sshll.u32 %s251_s0, 4  ;;  %s191_s21 = smov [#allocation5]  }
   0x2   :  { %s21_s20 = scalar_lea.hbm %s253_s2, %s132_s17  ;;  %s24_s22 = sshll.u32 %s191_s21, 4  ;;  %s25_s22 = int_to_ptr.vmem [resolvable:$true] %s24_s22 }
   0x3   :  { %s22_s23 = sshll.u32 %s21_s20, 4  ;;  %s143_s28 = scalar_lea.hbm %s253_s2, 48  ;;  %s23_s23 = int_to_ptr.hbm [resolvable:$true] %s22_s23 }
   0x4   :  { %s139_s24 = sshra.s32 %s23_s23, 4  ;;  %s140_s24 = int_to_ptr.hbm [resolvable:$true] %s139_s24 }
   0x5   :  { %s141_s25 = scalar_lea.hbm %s140_s24, 16  ;;  %p144_p1 = scmp.lt.s32.totalorder %s140_s24, %s253_s2 }
   0x6   :  { %p142_p0 = scmp.ne.s32.totalorder %s140_s24, %s141_s25  ;;  %p145_p2 = scmp.lt.s32.totalorder %s143_s28, %s141_s25 }
   0x8   :  { %p146_p3 = por %p145_p2, %p144_p1 }
   0xa   :  { %p147_p4 = pnand %p146_p3, %p142_p0 }
   0xc   :  { %150 = shalt.err (!%p147_p4)
}
   0xd   :  { %s192_s5 = smov 128   ;;  %s193_s6 = smov 8  }
   0xe   :  { %30 = dma.hbm_to_vmem [thread:$0]  %s23_s23, 256, %s25_s22, [#allocation6], %s192_s5, %s192_s5, %s193_s6  }
   0xf   :  { %187 = dma.done.wait [#allocation6], 256  }
  0x10   :  { %188 = vsyncadd [#allocation6], 4294967040  ;;  %vm56_vm0 = vcmask 130048   ;;  %v194_v0 = vmov 0.0   ;;  %vm62_vm1 = vcmask 261120   ;;  %v61_v1 = vld [vmem:[#allocation5 + $0x8] sm:$0xff] }
  0x11   :  { %57 = vst.msk [vmem:[#allocation2] sm:$0xff] %vm56_vm0, %v194_v0  ;;  %129 = vmatpush.xpose.msk.msra.mxu0 %vm62_vm1, %v61_v1  ;;  %v60_v2 = vld [vmem:[#allocation5] sm:$0xff]  ;;  %v59_v3 = vld [vmem:[%s252_s1] sm:$0xff]  ;;  %p48_p5 = scmp.lt.s32.totalorder %s251_s0, 2  ;;  %s195_s1 = smov [#allocation8]  }
  0x12   :  { %s110_s15 = sshll.u32 %s195_s1, 4  ;;  %s112_s18 = sshll.u32 %s255_s4, 4  ;;  %s111_s15 = int_to_ptr.vmem [resolvable:$true] %s110_s15  ;;  %s113_s18 = int_to_ptr.hbm [resolvable:$true] %s112_s18 }
  0x13   :  { %s257_s0 = smov (!%p48_p5, %s251_s0), 2 }
  0x14   :  { %s50_s14 = scalar_lea.vmem %s254_s3, %s257_s0 }
  0x15   :  { %130 = vmatpush.xpose.msk.msra.mxu0 %vm62_vm1, %v60_v2  ;;  %v138_v7 = vld [vmem:[%s50_s14] ss:$0 sm:$0xff] }
  0x18   :  { %131 = vmatmul.msk.f32.vlgmr.msra.gmra.mxu0 %vm62_vm1, %v59_v3  ;;  %v58_v4 = vld [vmem:[#allocation2] sm:$0xff] }
  0x95   :  { %v89_v5 = vpop.f32.mrf.mxu0 }
  0x96   :  { %v92_v6 = vadd.f32 %v89_v5, %v58_v4 }
  0x98   :  { %94 = vst.msk [vmem:[#allocation2] sm:$0xff] %vm56_vm0, %v92_v6 }
  0x9f   :  { %v98_v8 = vld [vmem:[#allocation2] sm:$0xff] }
  0xa0   :  { %v103_v9 = vadd.f32 %v138_v7, %v98_v8 }
  0xa2   :  { %104 = vst.msk [vmem:[#allocation8] sm:$0xff] %vm56_vm0, %v103_v9 }
  0xa3   :  { %115 = dma.vmem_to_hbm [thread:$0]  %s111_s15, 128, %s113_s18, [#allocation7]  }
  0xa4   :  { %189 = dma.done.wait [#allocation7], 128  }
  0xa5   :  { %190 = vsyncadd [#allocation7], 4294967168 }
  0xa6   :  { %120 = vsyncpa [#allocation6], 1 }
  0xa7   :  { %121 = vsyncpa [#allocation7], 1 }

</bundles_post_ra>
